<compile_context>
chip_gen: v6e
topology: v6e:2x2x1
jax: 0.10.0
libtpu: 0.0.40
codegen_flags: <defaults>
</compile_context>

<pallas_src>
import jax
import jax.numpy as jnp
from jax.experimental import pallas as pl
from jax.experimental.pallas import tpu as pltpu


def _round_up(x, m):
    return (x + m - 1) // m * m


def _prop_relu_w2_kernel(a_ref, xw1_ref, w2_ref, b1_ref, hw2_ref, acc_ref):
    """HW2 = relu(A_row_tile @ XW1 + b1) @ W2, reducing over A_hat columns."""
    k = pl.program_id(1)

    @pl.when(k == 0)
    def _():
        acc_ref[...] = jnp.zeros_like(acc_ref)

    acc_ref[...] += jnp.dot(
        a_ref[...], xw1_ref[...], preferred_element_type=jnp.float32
    )

    @pl.when(k == pl.num_programs(1) - 1)
    def _():
        h = jnp.maximum(acc_ref[...] + b1_ref[...], 0.0)
        hw2_ref[...] = jnp.dot(
            h.astype(w2_ref.dtype), w2_ref[...],
            preferred_element_type=jnp.float32,
        ).astype(hw2_ref.dtype)


def _prop_bias_kernel(a_ref, hw2_ref, b2_ref, out_ref, acc_ref):
    """out = A_row_tile @ HW2 + b2, reducing over A_hat columns."""
    k = pl.program_id(1)

    @pl.when(k == 0)
    def _():
        acc_ref[...] = jnp.zeros_like(acc_ref)

    acc_ref[...] += jnp.dot(
        a_ref[...], hw2_ref[...], preferred_element_type=jnp.float32
    )

    @pl.when(k == pl.num_programs(1) - 1)
    def _():
        out_ref[...] = (acc_ref[...] + b2_ref[...]).astype(out_ref.dtype)


def gcn_forward(a_hat, x, w1, b1, w2, b2, *, tile=512):
    """Two-layer GCN forward on a dense normalized adjacency a_hat [N, N]."""
    n = x.shape[0]
    hid = w1.shape[1]
    out_dim = w2.shape[1]
    f_pad = _round_up(max(hid, out_dim), 128)

    # One tile value for both the row (TM) and reduction (TK) axes keeps the
    # padded node count divisible by both.
    t = min(tile, _round_up(n, 128))
    n_pad = _round_up(n, t)

    # --- pad + cast. Zero padding keeps ghost nodes from leaking: padded
    # A_hat rows/cols are zero, so they contribute nothing to real rows, and
    # padded rows are sliced off at the end. ---
    a_p = jnp.zeros((n_pad, n_pad), jnp.float32).at[:n, :n].set(a_hat)
    a_bf = a_p.astype(jnp.bfloat16)

    # Feature transform hoisted out of the A_hat loop (tiny matmul).
    xw1 = x @ w1  # [n, hid], f32
    xw1_p = jnp.zeros((n_pad, f_pad), jnp.float32).at[:n, :hid].set(xw1)
    xw1_bf = xw1_p.astype(jnp.bfloat16)

    w2_p = jnp.zeros((f_pad, f_pad), jnp.float32).at[:hid, :out_dim].set(w2)
    w2_bf = w2_p.astype(jnp.bfloat16)

    b1_p = jnp.zeros((1, f_pad), jnp.float32).at[:, :hid].set(
        b1.reshape(1, -1))
    b2_p = jnp.zeros((1, f_pad), jnp.float32).at[:, :out_dim].set(
        b2.reshape(1, -1))

    grid = (n_pad // t, n_pad // t)
    cparams = pltpu.CompilerParams(
        dimension_semantics=("parallel", "arbitrary"),
        vmem_limit_bytes=64 * 1024 * 1024,
    )

    a_spec = pl.BlockSpec((t, t), lambda i, k: (i, k))
    feat_k_spec = pl.BlockSpec((t, f_pad), lambda i, k: (k, 0))
    feat_i_spec = pl.BlockSpec((t, f_pad), lambda i, k: (i, 0))
    mat_spec = pl.BlockSpec((f_pad, f_pad), lambda i, k: (0, 0))
    bias_spec = pl.BlockSpec((1, f_pad), lambda i, k: (0, 0))
    acc_scratch = pltpu.VMEM((t, f_pad), jnp.float32)

    # Layer 1 propagation fused with bias + ReLU + (H @ W2).
    hw2 = pl.pallas_call(
        _prop_relu_w2_kernel,
        out_shape=jax.ShapeDtypeStruct((n_pad, f_pad), jnp.bfloat16),
        grid_spec=pltpu.PrefetchScalarGridSpec(
            num_scalar_prefetch=0,
            grid=grid,
            in_specs=[a_spec, feat_k_spec, mat_spec, bias_spec],
            out_specs=feat_i_spec,
            scratch_shapes=[acc_scratch],
        ),
        compiler_params=cparams,
    )(a_bf, xw1_bf, w2_bf, b1_p)

    # Layer 2 propagation + bias.
    out_p = pl.pallas_call(
        _prop_bias_kernel,
        out_shape=jax.ShapeDtypeStruct((n_pad, f_pad), jnp.float32),
        grid_spec=pltpu.PrefetchScalarGridSpec(
            num_scalar_prefetch=0,
            grid=grid,
            in_specs=[a_spec, feat_k_spec, bias_spec],
            out_specs=feat_i_spec,
            scratch_shapes=[acc_scratch],
        ),
        compiler_params=cparams,
    )(a_bf, hw2, b2_p)

    return out_p[:n, :out_dim]


def build_normalized_adjacency(edge_index, num_nodes, edge_weight=None):
    """Dense A_hat = D^{-1/2} (A + I) D^{-1/2} from a [2, E] edge_index."""
    src, dst = edge_index[0], edge_index[1]
    if edge_weight is None:
        edge_weight = jnp.ones(src.shape[0], jnp.float32)
    a = jnp.zeros((num_nodes, num_nodes), jnp.float32)
    # message flows src -> dst; accumulate (matches PyG gcn_norm on multigraphs)
    a = a.at[dst, src].add(edge_weight)
    a = a + jnp.eye(num_nodes, dtype=jnp.float32)  # self loops
    deg = jnp.sum(a, axis=1)
    d_inv_sqrt = jnp.where(deg > 0, 1.0 / jnp.sqrt(deg), 0.0)
    return d_inv_sqrt[:, None] * a * d_inv_sqrt[None, :]


if __name__ == "__main__":
    # --- data (same values as the PyTorch script; Color.RED=0, Color.BLUE=1) ---
    edge_index = jnp.array(
        [[0, 0, 1, 1, 2, 2, 3, 3], [1, 2, 0, 3, 0, 3, 1, 2]], dtype=jnp.int32
    )
    x = jnp.array(
        [[4.0, 0.0], [4.0, 1.0], [2.0, 0.0], [2.0, 1.0]], dtype=jnp.float32
    )
    num_nodes, in_dim = x.shape  # 4 nodes, 2 input features
    hid_dim, out_dim = 8, 4

    # --- deterministic parameter init (synthetic, not a checkpoint load) ---
    key = jax.random.PRNGKey(0)
    k1, k2, k3, k4 = jax.random.split(key, 4)
    w1 = jax.random.normal(k1, (in_dim, hid_dim), jnp.float32) * 0.5
    b1 = jax.random.normal(k2, (1, hid_dim), jnp.float32) * 0.1
    w2 = jax.random.normal(k3, (hid_dim, out_dim), jnp.float32) * 0.5
    b2 = jax.random.normal(k4, (1, out_dim), jnp.float32) * 0.1

    a_hat = build_normalized_adjacency(edge_index, num_nodes)

    out = gcn_forward(a_hat, x, w1, b1, w2, b2)
    jax.block_until_ready(out)
    assert out.shape == (num_nodes, out_dim)

    # --- reference 1: full-f32 semantics (loose tol; kernel uses bf16 data) ---
    h_ref = jnp.maximum(a_hat @ (x @ w1) + b1, 0.0)
    out_ref = a_hat @ (h_ref @ w2) + b2
    assert jnp.allclose(out, out_ref, atol=5e-2, rtol=5e-2), \
        "mismatch vs f32 reference"

    # --- reference 2: bf16-consistent reference (tight tol) ---
    f32 = lambda v: v.astype(jnp.float32)
    q = lambda v: f32(v.astype(jnp.bfloat16))
    a_q = q(a_hat)
    h_q = jnp.maximum(a_q @ q(x @ w1) + b1, 0.0)
    hw2_q = q(q(h_q) @ q(w2))
    out_q = a_q @ hw2_q + b2
    assert jnp.allclose(out, out_q, atol=1e-3, rtol=1e-3), \
        "mismatch vs bf16-consistent reference"

    print("KERNEL_OK")
</pallas_src>

<mosaic_0001>
module attributes {stable_mosaic.version = 11 : i64} {
  func.func @_prop_relu_w2_kernel(%arg0: i32, %arg1: i32, %arg2: memref<128x128xbf16, #tpu.memory_space<vmem>>, %arg3: memref<128x128xbf16, #tpu.memory_space<vmem>>, %arg4: memref<128x128xbf16, #tpu.memory_space<vmem>>, %arg5: memref<1x128xf32, #tpu.memory_space<vmem>>, %arg6: memref<128x128xbf16, #tpu.memory_space<vmem>>, %arg7: memref<128x128xf32, #tpu.memory_space<vmem>>) attributes {dimension_semantics = [#tpu.dimension_semantics<parallel>, #tpu.dimension_semantics<arbitrary>], iteration_bounds = array<i64: 1, 1>, scalar_prefetch = 0 : i64, scratch_operands = 1 : i64, tpu.core_type = #tpu.core_type<tc>, window_params = [{transform_indices = @transform_0, window_bounds = array<i64: 128, 128>}, {transform_indices = @transform_1, window_bounds = array<i64: 128, 128>}, {pipeline_mode = #tpu.pipeline_mode<synchronous>, transform_indices = @transform_2, window_bounds = array<i64: 128, 128>}, {pipeline_mode = #tpu.pipeline_mode<synchronous>, transform_indices = @transform_3, window_bounds = array<i64: 1, 128>}, {transform_indices = @transform_4, window_bounds = array<i64: 128, 128>}]} {
    %c0_i32 = arith.constant 0 : i32
    %0 = arith.cmpi eq, %arg1, %c0_i32 : i32
    %1 = arith.extui %0 : i1 to i32
    %c0_i32_0 = arith.constant 0 : i32
    %2 = arith.cmpi ne, %1, %c0_i32_0 : i32
    scf.if %2 {
      %cst_10 = arith.constant 0.000000e+00 : f32
      %12 = vector.broadcast %cst_10 : f32 to vector<128x128xf32>
      %c0_11 = arith.constant 0 : index
      %c0_12 = arith.constant 0 : index
      %13 = vector.load %arg7[%c0_11, %c0_12] : memref<128x128xf32, #tpu.memory_space<vmem>>, vector<128x128xf32>
      tpu.vector_store %arg7[%c0_11, %c0_12], %12 {strides = array<i32>} : memref<128x128xf32, #tpu.memory_space<vmem>>, vector<128x128xf32>,
    } else {
    }
    %c0 = arith.constant 0 : index
    %c0_1 = arith.constant 0 : index
    %3 = vector.load %arg7[%c0, %c0_1] : memref<128x128xf32, #tpu.memory_space<vmem>>, vector<128x128xf32>
    %c0_2 = arith.constant 0 : index
    %c0_3 = arith.constant 0 : index
    %4 = vector.load %arg2[%c0_2, %c0_3] : memref<128x128xbf16, #tpu.memory_space<vmem>>, vector<128x128xbf16>
    %c0_4 = arith.constant 0 : index
    %c0_5 = arith.constant 0 : index
    %5 = vector.load %arg3[%c0_4, %c0_5] : memref<128x128xbf16, #tpu.memory_space<vmem>>, vector<128x128xbf16>
    %cst = arith.constant dense<0.000000e+00> : vector<128x128xf32>
    %6 = tpu.matmul %4, %5, %cst {dimension_numbers = #tpu.dot_dimension_numbers<[1], [0], [0], [1], [0, 0, 1, 1], [], []>} : vector<128x128xbf16>, vector<128x128xbf16>, vector<128x128xf32> -> vector<128x128xf32>
    %7 = arith.addf %3, %6 : vector<128x128xf32>
    %c0_6 = arith.constant 0 : index
    %c0_7 = arith.constant 0 : index
    %8 = vector.load %arg7[%c0_6, %c0_7] : memref<128x128xf32, #tpu.memory_space<vmem>>, vector<128x128xf32>
    tpu.vector_store %arg7[%c0_6, %c0_7], %7 {strides = array<i32>} : memref<128x128xf32, #tpu.memory_space<vmem>>, vector<128x128xf32>,
    %c0_i32_8 = arith.constant 0 : i32
    %9 = arith.cmpi eq, %arg1, %c0_i32_8 : i32
    %10 = arith.extui %9 : i1 to i32
    %c0_i32_9 = arith.constant 0 : i32
    %11 = arith.cmpi ne, %10, %c0_i32_9 : i32
    scf.if %11 {
      %c0_10 = arith.constant 0 : index
      %c0_11 = arith.constant 0 : index
      %12 = vector.load %arg7[%c0_10, %c0_11] : memref<128x128xf32, #tpu.memory_space<vmem>>, vector<128x128xf32>
      %c0_12 = arith.constant 0 : index
      %c0_13 = arith.constant 0 : index
      %13 = vector.load %arg5[%c0_12, %c0_13] : memref<1x128xf32, #tpu.memory_space<vmem>>, vector<1x128xf32>
      %14 = vector.broadcast %13 : vector<1x128xf32> to vector<128x128xf32>
      %15 = arith.addf %12, %14 : vector<128x128xf32>
      %cst_14 = arith.constant 0.000000e+00 : f32
      %16 = vector.broadcast %cst_14 : f32 to vector<128x128xf32>
      %17 = arith.maximumf %15, %16 : vector<128x128xf32>
      %18 = arith.truncf %17 : vector<128x128xf32> to vector<128x128xbf16>
      %c0_15 = arith.constant 0 : index
      %c0_16 = arith.constant 0 : index
      %19 = vector.load %arg4[%c0_15, %c0_16] : memref<128x128xbf16, #tpu.memory_space<vmem>>, vector<128x128xbf16>
      %cst_17 = arith.constant dense<0.000000e+00> : vector<128x128xf32>
      %20 = tpu.matmul %18, %19, %cst_17 {dimension_numbers = #tpu.dot_dimension_numbers<[1], [0], [0], [1], [0, 0, 1, 1], [], []>} : vector<128x128xbf16>, vector<128x128xbf16>, vector<128x128xf32> -> vector<128x128xf32>
      %21 = arith.truncf %20 : vector<128x128xf32> to vector<128x128xbf16>
      %c0_18 = arith.constant 0 : index
      %c0_19 = arith.constant 0 : index
      %22 = vector.load %arg6[%c0_18, %c0_19] : memref<128x128xbf16, #tpu.memory_space<vmem>>, vector<128x128xbf16>
      tpu.vector_store %arg6[%c0_18, %c0_19], %21 {strides = array<i32>} : memref<128x128xbf16, #tpu.memory_space<vmem>>, vector<128x128xbf16>,
    } else {
    }
    return
  }
  func.func @transform_0(%arg0: i32, %arg1: i32) -> (i32, i32) {
    %c0_i32 = arith.constant 0 : i32
    return %arg0, %arg1 : i32, i32
  }
  func.func @transform_1(%arg0: i32, %arg1: i32) -> (i32, i32) {
    %c0_i32 = arith.constant 0 : i32
    %c0_i32_0 = arith.constant 0 : i32
    return %arg1, %c0_i32 : i32, i32
  }
  func.func @transform_2(%arg0: i32, %arg1: i32) -> (i32, i32) {
    %c0_i32 = arith.constant 0 : i32
    %c0_i32_0 = arith.constant 0 : i32
    %c0_i32_1 = arith.constant 0 : i32
    return %c0_i32, %c0_i32_0 : i32, i32
  }
  func.func @transform_3(%arg0: i32, %arg1: i32) -> (i32, i32) {
    %c0_i32 = arith.constant 0 : i32
    %c0_i32_0 = arith.constant 0 : i32
    %c0_i32_1 = arith.constant 0 : i32
    return %c0_i32, %c0_i32_0 : i32, i32
  }
  func.func @transform_4(%arg0: i32, %arg1: i32) -> (i32, i32) {
    %c0_i32 = arith.constant 0 : i32
    %c0_i32_0 = arith.constant 0 : i32
    return %arg0, %c0_i32 : i32, i32
  }
}

</mosaic_0001>

<bundles_post_ra>
// kernel: tpu_custom_call.1
= control target key start
LH: loop header
LB: loop body
LE: loop exit
PB: predicated region body
PF: predicated region fallthrough
CT: control target
= control target key end

     0   :  { %9 = vsyncpa [#allocation4], 0  ;;  %s1052_s0 = inlined_call_operand.hbm [shape: bf16[128,128], index: 0, kind: input, shape index: {}]   ;;  %s1053_s1 = inlined_call_operand.hbm [shape: bf16[128,128], index: 1, kind: input, shape index: {}]   ;;  %s1054_s2 = inlined_call_operand.hbm [shape: bf16[128,128], index: 2, kind: input, shape index: {}]   ;;  %s1055_s3 = inlined_call_operand.vmem [shape: f32[1,128], index: 3, kind: input, shape index: {}]   ;;  %s1056_s4 = inlined_call_operand.hbm [shape: bf16[128,128], index: 4, kind: output, shape index: {}]  }
   0x1   :  { %10 = vsyncpa [#allocation7], 0 }
   0x2   :  { %11 = vsyncpa [#allocation5], 0  ;;  %s994_s15 = smov [#allocation6]   ;;  %s995_s17 = smov [#allocation3]  }
   0x3   :  { %s29_s16 = sshll.u32 %s994_s15, 4  ;;  %s17_s18 = sshll.u32 %s995_s17, 4  ;;  %s30_s16 = int_to_ptr.vmem [resolvable:$true] %s29_s16  ;;  %s18_s18 = int_to_ptr.vmem [resolvable:$true] %s17_s18 }
   0x4   :  { %s916_s19 = scalar_lea.vmem %s30_s16, 1024  ;;  %p921_p1 = scmp.lt.s32.totalorder %s30_s16, %s30_s16 }
   0x5   :  { %p917_p0 = scmp.ne.s32.totalorder %s30_s16, %s916_s19  ;;  %p922_p2 = scmp.lt.s32.totalorder %s916_s19, %s916_s19 }
   0x7   :  { %p923_p3 = por %p922_p2, %p921_p1 }
   0x9   :  { %p924_p4 = pnand %p923_p3, %p917_p0 }
   0xb   :  { %927 = shalt.err (!%p924_p4)
}
   0xc   :  { %s996_s20 = smov 64   ;;  %s997_s21 = smov 4  }
   0xd   :  { %35 = dma.hbm_to_vmem [thread:$0]  %s1053_s1, 1024, %s30_s16, [#allocation7], %s996_s20, %s996_s20, %s997_s21  }
   0xe   :  { %s936_s24 = scalar_lea.vmem %s18_s18, 1024  ;;  %p941_p6 = scmp.lt.s32.totalorder %s18_s18, %s18_s18 }
   0xf   :  { %p937_p5 = scmp.ne.s32.totalorder %s18_s18, %s936_s24  ;;  %p942_p7 = scmp.lt.s32.totalorder %s936_s24, %s936_s24 }
  0x11   :  { %p943_p8 = por %p942_p7, %p941_p6 }
  0x13   :  { %p944_p9 = pnand %p943_p8, %p937_p5 }
  0x15   :  { %947 = shalt.err (!%p944_p9)
}
  0x16   :  { %23 = dma.hbm_to_vmem [thread:$0]  %s1052_s0, 1024, %s18_s18, [#allocation4], %s996_s20, %s996_s20, %s997_s21  }
  0x17   :  { %s998_s27 = smov [#allocation8]  }
  0x18   :  { %s41_s28 = sshll.u32 %s998_s27, 4  ;;  %s42_s28 = int_to_ptr.vmem [resolvable:$true] %s41_s28 }
  0x19   :  { %s956_s29 = scalar_lea.vmem %s42_s28, 1024  ;;  %p961_p11 = scmp.lt.s32.totalorder %s42_s28, %s42_s28 }
  0x1a   :  { %p957_p10 = scmp.ne.s32.totalorder %s42_s28, %s956_s29  ;;  %p962_p12 = scmp.lt.s32.totalorder %s956_s29, %s956_s29 }
  0x1c   :  { %p963_p13 = por %p962_p12, %p961_p11 }
  0x1e   :  { %p964_p0 = pnand %p963_p13, %p957_p10 }
  0x20   :  { %967 = shalt.err (!%p964_p0)
}
  0x21   :  { %47 = dma.hbm_to_vmem [thread:$0]  %s1054_s2, 1024, %s42_s28, [#allocation7], %s996_s20, %s996_s20, %s997_s21  }
  0x22   :  { %988 = dma.done.wait [#allocation4], 1024  }
  0x23   :  { %989 = vsyncadd [#allocation4], 4294966272 }
  0x24   :  { %990 = dma.done.wait [#allocation7], 2048  }
  0x25   :  { %991 = vsyncadd [#allocation7], 4294965248  ;;  %v884_v0 = vld [vmem:[#allocation6 + $0x38] sm:$0xff]   ;;  %v885_v1 = vld [vmem:[#allocation6 + $0x30] sm:$0xff]  }
  0x26   :  { %814 = vmatprep.subr.bf16.mxu0 %v884_v0  ;;  %v886_v2 = vld [vmem:[#allocation6 + $0x28] sm:$0xff]   ;;  %v887_v3 = vld [vmem:[#allocation6 + $0x20] sm:$0xff]   ;;  %v888_v5 = vld [vmem:[#allocation6 + $0x18] sm:$0xff]  }
  0x27   :  { %815 = vmatpush3.bf16.msra.mxu0 %v884_v0  ;;  %v892_v4 = vld [vmem:[#allocation3] sm:$0xff]   ;;  %v889_v6 = vld [vmem:[#allocation6 + $0x10] sm:$0xff]   ;;  %v900_v7 = vld [vmem:[#allocation8 + $0x38] sm:$0xff]  }
  0x28   :  { %816 = vmatprep.subr.bf16.mxu0 %v885_v1  ;;  %830 = vmatprep.mubr.bf16.mxu0 %v892_v4  ;;  %v901_v8 = vld [vmem:[#allocation8 + $0x30] sm:$0xff]   ;;  %v890_v9 = vld [vmem:[#allocation6 + $0x8] sm:$0xff]   ;;  %v891_v11 = vld [vmem:[#allocation6] sm:$0xff]  }
  0x29   :  { %846 = vmatprep.subr.bf16.mxu1 %v900_v7  ;;  %v902_v10 = vld [vmem:[#allocation8 + $0x28] sm:$0xff]   ;;  %v903_v12 = vld [vmem:[#allocation8 + $0x20] sm:$0xff]   ;;  %v904_v13 = vld [vmem:[#allocation8 + $0x18] sm:$0xff]  }
  0x2a   :  { %847 = vmatpush3.bf16.msra.mxu1 %v900_v7  ;;  %v893_v14 = vld [vmem:[#allocation3 + $0x8] sm:$0xff]   ;;  %v894_v15 = vld [vmem:[#allocation3 + $0x10] sm:$0xff]   ;;  %v895_v16 = vld [vmem:[#allocation3 + $0x18] sm:$0xff]  }
  0x2b   :  { %817 = vmatpush3.bf16.msra.mxu0 %v885_v1  ;;  %848 = vmatprep.subr.bf16.mxu1 %v901_v8  ;;  %v896_v17 = vld [vmem:[#allocation3 + $0x20] sm:$0xff]   ;;  %v897_v18 = vld [vmem:[#allocation3 + $0x28] sm:$0xff]   ;;  %v898_v19 = vld [vmem:[#allocation3 + $0x30] sm:$0xff]  }
  0x2c   :  { %818 = vmatprep.subr.bf16.mxu0 %v886_v2  ;;  %v899_v20 = vld [vmem:[#allocation3 + $0x38] sm:$0xff]   ;;  %v905_v21 = vld [vmem:[#allocation8 + $0x10] sm:$0xff]   ;;  %v906_v22 = vld [vmem:[#allocation8 + $0x8] sm:$0xff]  }
  0x2d   :  { %v907_v23 = vld [vmem:[#allocation8] sm:$0xff]  }
  0x2e   :  { %849 = vmatpush3.bf16.msra.mxu1 %v901_v8  ;;  %v694_v26 = vld [vmem:[%s1055_s3] ss:$0 sm:$0xff]  ;;  %s999_s3 = smov [#allocation9]  }
  0x2f   :  { %819 = vmatpush3.bf16.msra.mxu0 %v886_v2  ;;  %850 = vmatprep.subr.bf16.mxu1 %v902_v10  ;;  %s665_s5 = sshll.u32 %s999_s3, 4  ;;  %s666_s5 = int_to_ptr.vmem [resolvable:$true] %s665_s5 }
  0x30   :  { %820 = vmatprep.subr.bf16.mxu0 %v887_v3  ;;  %s968_s6 = scalar_lea.vmem %s666_s5, 1024  ;;  %p973_p2 = scmp.lt.s32.totalorder %s666_s5, %s666_s5 }
  0x31   :  { %p969_p1 = scmp.ne.s32.totalorder %s666_s5, %s968_s6  ;;  %p974_p3 = scmp.lt.s32.totalorder %s968_s6, %s968_s6 }
  0x32   :  { %851 = vmatpush3.bf16.msra.mxu1 %v902_v10 }
  0x33   :  { %821 = vmatpush3.bf16.msra.mxu0 %v887_v3  ;;  %852 = vmatprep.subr.bf16.mxu1 %v903_v12  ;;  %p975_p4 = por %p974_p3, %p973_p2 }
  0x34   :  { %822 = vmatprep.subr.bf16.mxu0 %v888_v5 }
  0x35   :  { %p976_p5 = pnand %p975_p4, %p969_p1 }
  0x36   :  { %853 = vmatpush3.bf16.msra.mxu1 %v903_v12 }
  0x37   :  { %823 = vmatpush3.bf16.msra.mxu0 %v888_v5  ;;  %854 = vmatprep.subr.bf16.mxu1 %v904_v13 }
  0x38   :  { %824 = vmatprep.subr.bf16.mxu0 %v889_v6 }
  0x3a   :  { %855 = vmatpush3.bf16.msra.mxu1 %v904_v13 }
  0x3b   :  { %825 = vmatpush3.bf16.msra.mxu0 %v889_v6  ;;  %856 = vmatprep.subr.bf16.mxu1 %v905_v21 }
  0x3c   :  { %826 = vmatprep.subr.bf16.mxu0 %v890_v9 }
  0x3e   :  { %857 = vmatpush3.bf16.msra.mxu1 %v905_v21 }
  0x3f   :  { %827 = vmatpush3.bf16.msra.mxu0 %v890_v9  ;;  %858 = vmatprep.subr.bf16.mxu1 %v906_v22 }
  0x40   :  { %828 = vmatprep.subr.bf16.mxu0 %v891_v11 }
  0x42   :  { %859 = vmatpush3.bf16.msra.mxu1 %v906_v22 }
  0x43   :  { %829 = vmatpush3.bf16.msra.mxu0 %v891_v11  ;;  %860 = vmatprep.subr.bf16.mxu1 %v907_v23 }
  0x46   :  { %831 = vmatmul.mubr.bf16.vlgmr.msra.gmra.mxu0 %v893_v14  ;;  %861 = vmatpush3.bf16.msra.mxu1 %v907_v23 }
  0x47   :  { %834 = vmatprep.mubr.bf16.mxu0 %v894_v15 }
  0x4e   :  { %835 = vmatmul.mubr.bf16.gmra.mxu0 %v895_v16 }
  0x4f   :  { %838 = vmatprep.mubr.bf16.mxu0 %v896_v17 }
  0x56   :  { %839 = vmatmul.mubr.bf16.gmra.mxu0 %v897_v18 }
  0x57   :  { %842 = vmatprep.mubr.bf16.mxu0 %v898_v19 }
  0x5e   :  { %843 = vmatmul.mubr.bf16.gmra.mxu0 %v899_v20 }
 0x106   :  { %v832_v24 = vpop.f32.mrf.mxu0 }
 0x107   :  { %v381_v30 = vadd.f32 %v832_v24, %v694_v26 }
 0x108   :  { %v258_v25 = vpop.f32.mrf.mxu0 }
 0x109   :  { %v379_v28 = vadd.f32 %v694_v26, %v258_v25  ;;  %v397_v37 = vmax.f32 %v381_v30, 0.0 }
 0x10a   :  { %v833_v27 = vpop.f32.mrf.mxu0 }
 0x10b   :  { %v382_v29 = vadd.f32 %v833_v27, %v694_v26  ;;  %v395_v35 = vmax.f32 %v379_v28, 0.0 }
 0x10c   :  { %v261_v31 = vpop.f32.mrf.mxu0 }
 0x10d   :  { %v380_v32 = vadd.f32 %v694_v26, %v261_v31  ;;  %v398_v33 = vmax.f32 %v382_v29, 0.0 }
 0x10e   :  { %v836_v34 = vpop.f32.mrf.mxu0 }
 0x10f   :  { %v396_v36 = vmax.f32 %v380_v32, 0.0  ;;  %v412_v40 = vpack.c.bf16 %v398_v33, %v397_v37  ;;  %v385_v44 = vadd.f32 %v836_v34, %v694_v26 }
 0x110   :  { %v274_v38 = vpop.f32.mrf.mxu0 }
 0x111   :  { %v411_v39 = vpack.c.bf16 %v396_v36, %v395_v35  ;;  %v383_v42 = vadd.f32 %v694_v26, %v274_v38  ;;  %v401_v51 = vmax.f32 %v385_v44, 0.0 }
 0x112   :  { %v837_v41 = vpop.f32.mrf.mxu0 }
 0x113   :  { %v386_v43 = vadd.f32 %v837_v41, %v694_v26  ;;  %862 = vmatprep.mubr.bf16.mxu1 %v411_v39  ;;  %v399_v49 = vmax.f32 %v383_v42, 0.0 }
 0x114   :  { %v277_v45 = vpop.f32.mrf.mxu0  ;;  %863 = vmatmul.mubr.bf16.vlgmr.msra.gmra.mxu1 %v412_v40 }
 0x115   :  { %v384_v46 = vadd.f32 %v694_v26, %v277_v45  ;;  %v402_v47 = vmax.f32 %v386_v43, 0.0 }
 0x116   :  { %v840_v48 = vpop.f32.mrf.mxu0 }
 0x117   :  { %v400_v50 = vmax.f32 %v384_v46, 0.0  ;;  %v414_v54 = vpack.c.bf16 %v402_v47, %v401_v51  ;;  %v389_v58 = vadd.f32 %v840_v48, %v694_v26 }
 0x118   :  { %v290_v52 = vpop.f32.mrf.mxu0 }
 0x119   :  { %v413_v53 = vpack.c.bf16 %v400_v50, %v399_v49  ;;  %v387_v56 = vadd.f32 %v694_v26, %v290_v52  ;;  %v405_v1 = vmax.f32 %v389_v58, 0.0 }
 0x11a   :  { %v841_v55 = vpop.f32.mrf.mxu0 }
 0x11b   :  { %v390_v57 = vadd.f32 %v841_v55, %v694_v26  ;;  %866 = vmatprep.mubr.bf16.mxu1 %v413_v53  ;;  %v403_v63 = vmax.f32 %v387_v56, 0.0 }
 0x11c   :  { %v293_v59 = vpop.f32.mrf.mxu0  ;;  %867 = vmatmul.mubr.bf16.gmra.mxu1 %v414_v54 }
 0x11d   :  { %v388_v60 = vadd.f32 %v694_v26, %v293_v59  ;;  %v406_v61 = vmax.f32 %v390_v57, 0.0 }
 0x11e   :  { %v844_v62 = vpop.f32.mrf.mxu0 }
 0x11f   :  { %v404_v0 = vmax.f32 %v388_v60, 0.0  ;;  %v416_v4 = vpack.c.bf16 %v406_v61, %v405_v1  ;;  %v393_v8 = vadd.f32 %v844_v62, %v694_v26 }
 0x120   :  { %v306_v2 = vpop.f32.mrf.mxu0 }
 0x121   :  { %v415_v3 = vpack.c.bf16 %v404_v0, %v403_v63  ;;  %v391_v6 = vadd.f32 %v694_v26, %v306_v2  ;;  %v409_v14 = vmax.f32 %v393_v8, 0.0 }
 0x122   :  { %v845_v5 = vpop.f32.mrf.mxu0 }
 0x123   :  { %v394_v7 = vadd.f32 %v845_v5, %v694_v26  ;;  %870 = vmatprep.mubr.bf16.mxu1 %v415_v3  ;;  %v407_v12 = vmax.f32 %v391_v6, 0.0 }
 0x124   :  { %v309_v9 = vpop.f32.mrf.mxu0  ;;  %871 = vmatmul.mubr.bf16.gmra.mxu1 %v416_v4 }
 0x125   :  { %v392_v10 = vadd.f32 %v694_v26, %v309_v9  ;;  %v410_v11 = vmax.f32 %v394_v7, 0.0 }
 0x127   :  { %v408_v13 = vmax.f32 %v392_v10, 0.0  ;;  %v418_v16 = vpack.c.bf16 %v410_v11, %v409_v14 }
 0x129   :  { %v417_v15 = vpack.c.bf16 %v408_v13, %v407_v12 }
 0x12b   :  { %874 = vmatprep.mubr.bf16.mxu1 %v417_v15 }
 0x12c   :  { %875 = vmatmul.mubr.bf16.gmra.mxu1 %v418_v16 }
 0x1d4   :  { %v864_v17 = vpop.f32.mrf.mxu1 }
 0x1d6   :  { %v517_v18 = vpop.f32.mrf.mxu1 }
 0x1d8   :  { %v865_v19 = vpop.f32.mrf.mxu1 }
 0x1d9   :  { %v743_v20 = vpack.c.bf16 %v865_v19, %v864_v17 }
 0x1da   :  { %v520_v21 = vpop.f32.mrf.mxu1 }
 0x1db   :  { %775 = vst [vmem:[#allocation9 + $0x8] sm:$0xff] %v743_v20   ;;  %v738_v22 = vpack.c.bf16 %v520_v21, %v517_v18 }
 0x1dc   :  { %v868_v23 = vpop.f32.mrf.mxu1 }
 0x1dd   :  { %739 = vst [vmem:[#allocation9] sm:$0xff] %v738_v22  }
 0x1de   :  { %v533_v24 = vpop.f32.mrf.mxu1 }
 0x1e0   :  { %v869_v25 = vpop.f32.mrf.mxu1 }
 0x1e1   :  { %v753_v26 = vpack.c.bf16 %v869_v25, %v868_v23 }
 0x1e2   :  { %v536_v27 = vpop.f32.mrf.mxu1 }
 0x1e3   :  { %777 = vst [vmem:[#allocation9 + $0x18] sm:$0xff] %v753_v26   ;;  %v748_v28 = vpack.c.bf16 %v536_v27, %v533_v24 }
 0x1e4   :  { %v872_v29 = vpop.f32.mrf.mxu1 }
 0x1e5   :  { %776 = vst [vmem:[#allocation9 + $0x10] sm:$0xff] %v748_v28  }
 0x1e6   :  { %v549_v30 = vpop.f32.mrf.mxu1 }
 0x1e8   :  { %v873_v31 = vpop.f32.mrf.mxu1 }
 0x1e9   :  { %v763_v32 = vpack.c.bf16 %v873_v31, %v872_v29 }
 0x1ea   :  { %v552_v33 = vpop.f32.mrf.mxu1 }
 0x1eb   :  { %779 = vst [vmem:[#allocation9 + $0x28] sm:$0xff] %v763_v32   ;;  %v758_v34 = vpack.c.bf16 %v552_v33, %v549_v30 }
 0x1ec   :  { %v876_v35 = vpop.f32.mrf.mxu1 }
 0x1ed   :  { %778 = vst [vmem:[#allocation9 + $0x20] sm:$0xff] %v758_v34  }
 0x1ee   :  { %v565_v36 = vpop.f32.mrf.mxu1 }
 0x1f0   :  { %v877_v37 = vpop.f32.mrf.mxu1 }
 0x1f1   :  { %v773_v38 = vpack.c.bf16 %v877_v37, %v876_v35 }
 0x1f2   :  { %v568_v39 = vpop.f32.mrf.mxu1 }
 0x1f3   :  { %781 = vst [vmem:[#allocation9 + $0x38] sm:$0xff] %v773_v38   ;;  %v768_v40 = vpack.c.bf16 %v568_v39, %v565_v36 }
 0x1f5   :  { %780 = vst [vmem:[#allocation9 + $0x30] sm:$0xff] %v768_v40  }
 0x1f6   :  { %979 = shalt.err (!%p976_p5)
}
 0x1f7   :  { %671 = dma.vmem_to_hbm [thread:$0]  %s666_s5, 1024, %s1056_s4, [#allocation5], %s996_s20, %s996_s20, %s997_s21  }
 0x1f8   :  { %992 = dma.done.wait [#allocation5], 1024  }
 0x1f9   :  { %993 = vsyncadd [#allocation5], 4294966272 }
 0x1fa   :  { %675 = vsyncpa [#allocation4], 1 }
 0x1fb   :  { %676 = vsyncpa [#allocation7], 1 }
 0x1fc   :  { %677 = vsyncpa [#allocation5], 1 }

</bundles_post_ra>
